<compile_context>
chip_gen: v5e
topology: v5e:2x2
jax: 0.10.0
libtpu: 0.0.40
codegen_flags: <defaults>
</compile_context>

<pallas_src>
import functools

import jax
import jax.numpy as jnp
from jax.experimental import pallas as pl
from jax.experimental.pallas import tpu as pltpu

INPUT_SIZE = 3
OUTPUT_SIZE = 4
NUM_LAYERS = 12
UNITS = 256
NUM_HIDDEN = NUM_LAYERS - 2   # 10 hidden (256 -> 256) layers
OUT_PAD = 128                 # lane-dense padded output width
DEFAULT_TILE_ROWS = 1024      # fits comfortably in VMEM on v5e/v6e/v7x


def _round_up(x, m):
    return (x + m - 1) // m * m


def mlp_kernel(x_ref, y_ref, z_ref, w0_ref, b0_ref, wh_ref, bh_ref,
               wl_ref, bl_ref, o_ref):
    # ---- Layer 0 on the VPU: K=3 would waste a full MXU pass, so do three
    # broadcast multiply-adds instead ( (tile,1) x (1,256) broadcasts ).
    h = jnp.tanh(
        x_ref[...] * w0_ref[0:1, :]
        + y_ref[...] * w0_ref[1:2, :]
        + z_ref[...] * w0_ref[2:3, :]
        + b0_ref[...]
    )

    # ---- 10 hidden layers: bf16 MXU matmul, f32 accumulation, tanh.
    def body(i, h):
        acc = jnp.dot(h.astype(jnp.bfloat16), wh_ref[i],
                      preferred_element_type=jnp.float32)
        return jnp.tanh(acc + bh_ref[i])

    h = jax.lax.fori_loop(0, NUM_HIDDEN, body, h)

    # ---- Output layer, padded to 128 lanes so the store is an unmasked vst.
    out = jnp.dot(h.astype(jnp.bfloat16), wl_ref[...],
                  preferred_element_type=jnp.float32) + bl_ref[...]
    o_ref[...] = out.astype(o_ref.dtype)


@functools.partial(jax.jit, static_argnames=("tile_rows",))
def fully_connected_forward(x, y, z, params, tile_rows=DEFAULT_TILE_ROWS):
    """Pallas forward. x, y, z: (N, 1) float32. Returns (N, OUTPUT_SIZE) float32."""
    w0, b0, wh, bh, wl, bl = params
    n = x.shape[0]

    # Row tile: multiple of 8, capped at tile_rows; pad the batch to a multiple.
    tile = min(tile_rows, _round_up(max(n, 1), 8))
    n_pad = _round_up(n, tile)
    if n_pad != n:
        pad = ((0, n_pad - n), (0, 0))
        x = jnp.pad(x, pad)
        y = jnp.pad(y, pad)
        z = jnp.pad(z, pad)

    # Weight prep (once, in XLA): bf16 matmul weights, lane-dense padded last layer.
    wh_b = wh.astype(jnp.bfloat16)                                   # (10,256,256)
    wl_p = jnp.zeros((UNITS, OUT_PAD), jnp.bfloat16)
    wl_p = wl_p.at[:, :OUTPUT_SIZE].set(wl.astype(jnp.bfloat16))     # (256,128)
    bl_p = jnp.zeros((1, OUT_PAD), jnp.float32)
    bl_p = bl_p.at[:, :OUTPUT_SIZE].set(bl)                          # (1,128)

    grid = (n_pad // tile,)
    row_spec = pl.BlockSpec((tile, 1), lambda i: (i, 0))
    const2 = lambda i: (0, 0)
    const3 = lambda i: (0, 0, 0)

    out = pl.pallas_call(
        mlp_kernel,
        out_shape=jax.ShapeDtypeStruct((n_pad, OUT_PAD), jnp.float32),
        grid=grid,
        in_specs=[
            row_spec,                                            # x rows
            row_spec,                                            # y rows
            row_spec,                                            # z rows
            pl.BlockSpec((INPUT_SIZE, UNITS), const2),           # w0  (resident)
            pl.BlockSpec((1, UNITS), const2),                    # b0  (resident)
            pl.BlockSpec((NUM_HIDDEN, UNITS, UNITS), const3),    # wh  (resident)
            pl.BlockSpec((NUM_HIDDEN, 1, UNITS), const3),        # bh  (resident)
            pl.BlockSpec((UNITS, OUT_PAD), const2),              # wl  (resident)
            pl.BlockSpec((1, OUT_PAD), const2),                  # bl  (resident)
        ],
        out_specs=pl.BlockSpec((tile, OUT_PAD), lambda i: (i, 0)),
        compiler_params=pltpu.CompilerParams(
            dimension_semantics=("parallel",),     # shards row tiles across TCs on v7x
            vmem_limit_bytes=48 << 20,             # safe on 64 MiB (v7x) and 128 MiB chips
        ),
    )(x, y, z, w0, b0, wh_b, bh, wl_p, bl_p)

    return out[:n, :OUTPUT_SIZE]


def init_params(key):
    """Deterministic init mimicking nn.Linear's U(-1/sqrt(fan_in), 1/sqrt(fan_in))."""
    keys = jax.random.split(key, 2 * NUM_LAYERS)

    def linear(kw, kb, fan_in, fan_out):
        bound = 1.0 / jnp.sqrt(float(fan_in))
        w = jax.random.uniform(kw, (fan_in, fan_out), jnp.float32, -bound, bound)
        b = jax.random.uniform(kb, (fan_out,), jnp.float32, -bound, bound)
        return w, b

    w0, b0 = linear(keys[0], keys[1], INPUT_SIZE, UNITS)
    wh_list, bh_list = [], []
    for i in range(NUM_HIDDEN):
        w, b = linear(keys[2 + 2 * i], keys[3 + 2 * i], UNITS, UNITS)
        wh_list.append(w)
        bh_list.append(b.reshape(1, UNITS))
    wh = jnp.stack(wh_list, axis=0)          # (10, 256, 256)
    bh = jnp.stack(bh_list, axis=0)          # (10, 1, 256)
    wl, bl = linear(keys[-2], keys[-1], UNITS, OUTPUT_SIZE)
    return (w0, b0.reshape(1, UNITS), wh, bh, wl, bl.reshape(1, OUTPUT_SIZE))


def reference_forward(x, y, z, params):
    """Pure-JAX f32 reference for correctness checking."""
    w0, b0, wh, bh, wl, bl = params
    h = jnp.concatenate([x, y, z], axis=1)
    h = jnp.tanh(h @ w0 + b0)
    for i in range(NUM_HIDDEN):
        h = jnp.tanh(h @ wh[i] + bh[i])
    return h @ wl + bl


if __name__ == "__main__":
    key = jax.random.PRNGKey(0)
    kp, kx, ky, kz = jax.random.split(key, 4)
    params = init_params(kp)

    # --- Small batch (grid of 1).
    N = 8
    x = jax.random.normal(kx, (N, 1), jnp.float32)
    y = jax.random.normal(ky, (N, 1), jnp.float32)
    z = jax.random.normal(kz, (N, 1), jnp.float32)

    out = jax.block_until_ready(fully_connected_forward(x, y, z, params))
    ref = jax.block_until_ready(reference_forward(x, y, z, params))
    assert out.shape == (N, OUTPUT_SIZE)
    # bf16 MXU operands with f32 accumulation -> loosened tolerance vs f32 reference.
    assert jnp.allclose(out, ref, atol=2e-2, rtol=2e-2), "Pallas output mismatch (N=8)"

    # --- Larger, non-multiple batch to exercise the row grid + padding path.
    N2 = 2053
    kx2, ky2, kz2 = jax.random.split(kz, 3)
    x2 = jax.random.normal(kx2, (N2, 1), jnp.float32)
    y2 = jax.random.normal(ky2, (N2, 1), jnp.float32)
    z2 = jax.random.normal(kz2, (N2, 1), jnp.float32)

    out2 = jax.block_until_ready(fully_connected_forward(x2, y2, z2, params))
    ref2 = jax.block_until_ready(reference_forward(x2, y2, z2, params))
    assert out2.shape == (N2, OUTPUT_SIZE)
    assert jnp.allclose(out2, ref2, atol=2e-2, rtol=2e-2), "Pallas output mismatch (N=2053)"

    print("KERNEL_OK")
</pallas_src>

<mosaic_0001>
module attributes {stable_mosaic.version = 11 : i64} {
  func.func @mlp_kernel(%arg0: i32, %arg1: memref<8x1xf32, #tpu.memory_space<vmem>>, %arg2: memref<8x1xf32, #tpu.memory_space<vmem>>, %arg3: memref<8x1xf32, #tpu.memory_space<vmem>>, %arg4: memref<3x256xf32, #tpu.memory_space<vmem>>, %arg5: memref<1x256xf32, #tpu.memory_space<vmem>>, %arg6: memref<10x256x256xbf16, #tpu.memory_space<vmem>>, %arg7: memref<10x1x256xf32, #tpu.memory_space<vmem>>, %arg8: memref<256x128xbf16, #tpu.memory_space<vmem>>, %arg9: memref<1x128xf32, #tpu.memory_space<vmem>>, %arg10: memref<8x128xf32, #tpu.memory_space<vmem>>) attributes {dimension_semantics = [#tpu.dimension_semantics<parallel>], iteration_bounds = array<i64: 1>, scalar_prefetch = 0 : i64, scratch_operands = 0 : i64, tpu.core_type = #tpu.core_type<tc>, window_params = [{transform_indices = @transform_0, window_bounds = array<i64: 8, 1>}, {transform_indices = @transform_1, window_bounds = array<i64: 8, 1>}, {transform_indices = @transform_2, window_bounds = array<i64: 8, 1>}, {pipeline_mode = #tpu.pipeline_mode<synchronous>, transform_indices = @transform_3, window_bounds = array<i64: 3, 256>}, {pipeline_mode = #tpu.pipeline_mode<synchronous>, transform_indices = @transform_4, window_bounds = array<i64: 1, 256>}, {pipeline_mode = #tpu.pipeline_mode<synchronous>, transform_indices = @transform_5, window_bounds = array<i64: 10, 256, 256>}, {pipeline_mode = #tpu.pipeline_mode<synchronous>, transform_indices = @transform_6, window_bounds = array<i64: 10, 1, 256>}, {pipeline_mode = #tpu.pipeline_mode<synchronous>, transform_indices = @transform_7, window_bounds = array<i64: 256, 128>}, {pipeline_mode = #tpu.pipeline_mode<synchronous>, transform_indices = @transform_8, window_bounds = array<i64: 1, 128>}, {transform_indices = @transform_9, window_bounds = array<i64: 8, 128>}]} {
    %c0 = arith.constant 0 : index
    %c0_0 = arith.constant 0 : index
    %0 = vector.load %arg1[%c0, %c0_0] : memref<8x1xf32, #tpu.memory_space<vmem>>, vector<8x1xf32>
    %c0_1 = arith.constant 0 : index
    %c0_2 = arith.constant 0 : index
    %1 = vector.load %arg4[%c0_1, %c0_2] : memref<3x256xf32, #tpu.memory_space<vmem>>, vector<1x256xf32>
    %2 = vector.broadcast %0 : vector<8x1xf32> to vector<8x256xf32>
    %3 = vector.broadcast %1 : vector<1x256xf32> to vector<8x256xf32>
    %4 = arith.mulf %2, %3 : vector<8x256xf32>
    %c0_3 = arith.constant 0 : index
    %c0_4 = arith.constant 0 : index
    %5 = vector.load %arg2[%c0_3, %c0_4] : memref<8x1xf32, #tpu.memory_space<vmem>>, vector<8x1xf32>
    %c1 = arith.constant 1 : index
    %c0_5 = arith.constant 0 : index
    %6 = vector.load %arg4[%c1, %c0_5] : memref<3x256xf32, #tpu.memory_space<vmem>>, vector<1x256xf32>
    %7 = vector.broadcast %5 : vector<8x1xf32> to vector<8x256xf32>
    %8 = vector.broadcast %6 : vector<1x256xf32> to vector<8x256xf32>
    %9 = arith.mulf %7, %8 : vector<8x256xf32>
    %10 = arith.addf %4, %9 : vector<8x256xf32>
    %c0_6 = arith.constant 0 : index
    %c0_7 = arith.constant 0 : index
    %11 = vector.load %arg3[%c0_6, %c0_7] : memref<8x1xf32, #tpu.memory_space<vmem>>, vector<8x1xf32>
    %c2 = arith.constant 2 : index
    %c0_8 = arith.constant 0 : index
    %12 = vector.load %arg4[%c2, %c0_8] : memref<3x256xf32, #tpu.memory_space<vmem>>, vector<1x256xf32>
    %13 = vector.broadcast %11 : vector<8x1xf32> to vector<8x256xf32>
    %14 = vector.broadcast %12 : vector<1x256xf32> to vector<8x256xf32>
    %15 = arith.mulf %13, %14 : vector<8x256xf32>
    %16 = arith.addf %10, %15 : vector<8x256xf32>
    %c0_9 = arith.constant 0 : index
    %c0_10 = arith.constant 0 : index
    %17 = vector.load %arg5[%c0_9, %c0_10] : memref<1x256xf32, #tpu.memory_space<vmem>>, vector<1x256xf32>
    %18 = vector.broadcast %17 : vector<1x256xf32> to vector<8x256xf32>
    %19 = arith.addf %16, %18 : vector<8x256xf32>
    %20 = math.tanh %19 : vector<8x256xf32>
    %c0_i32 = arith.constant 0 : i32
    %c10_i32 = arith.constant 10 : i32
    %21 = arith.addi %c0_i32, %c10_i32 : i32
    %c1_i32 = arith.constant 1 : i32
    %22 = scf.for %arg11 = %c0_i32 to %21 step %c1_i32 iter_args(%arg12 = %20) -> (vector<8x256xf32>)  : i32 {
      %30 = arith.truncf %arg12 : vector<8x256xf32> to vector<8x256xbf16>
      %31 = arith.index_cast %arg11 : i32 to index
      %c0_18 = arith.constant 0 : index
      %c0_19 = arith.constant 0 : index
      %32 = vector.load %arg6[%31, %c0_18, %c0_19] : memref<10x256x256xbf16, #tpu.memory_space<vmem>>, vector<1x256x256xbf16>
      %33 = vector.shape_cast %32 : vector<1x256x256xbf16> to vector<256x256xbf16>
      %cst_20 = arith.constant dense<0.000000e+00> : vector<8x256xf32>
      %34 = tpu.matmul %30, %33, %cst_20 {dimension_numbers = #tpu.dot_dimension_numbers<[1], [0], [0], [1], [0, 0, 1, 1], [], []>} : vector<8x256xbf16>, vector<256x256xbf16>, vector<8x256xf32> -> vector<8x256xf32>
      %35 = arith.index_cast %arg11 : i32 to index
      %c0_21 = arith.constant 0 : index
      %c0_22 = arith.constant 0 : index
      %36 = vector.load %arg7[%35, %c0_21, %c0_22] : memref<10x1x256xf32, #tpu.memory_space<vmem>>, vector<1x1x256xf32>
      %37 = vector.shape_cast %36 : vector<1x1x256xf32> to vector<1x256xf32>
      %38 = vector.broadcast %37 : vector<1x256xf32> to vector<8x256xf32>
      %39 = arith.addf %34, %38 : vector<8x256xf32>
      %40 = math.tanh %39 : vector<8x256xf32>
      scf.yield %40 : vector<8x256xf32>
    }
    %c10_i32_11 = arith.constant 10 : i32
    %23 = arith.truncf %22 : vector<8x256xf32> to vector<8x256xbf16>
    %c0_12 = arith.constant 0 : index
    %c0_13 = arith.constant 0 : index
    %24 = vector.load %arg8[%c0_12, %c0_13] : memref<256x128xbf16, #tpu.memory_space<vmem>>, vector<256x128xbf16>
    %cst = arith.constant dense<0.000000e+00> : vector<8x128xf32>
    %25 = tpu.matmul %23, %24, %cst {dimension_numbers = #tpu.dot_dimension_numbers<[1], [0], [0], [1], [0, 0, 1, 1], [], []>} : vector<8x256xbf16>, vector<256x128xbf16>, vector<8x128xf32> -> vector<8x128xf32>
    %c0_14 = arith.constant 0 : index
    %c0_15 = arith.constant 0 : index
    %26 = vector.load %arg9[%c0_14, %c0_15] : memref<1x128xf32, #tpu.memory_space<vmem>>, vector<1x128xf32>
    %27 = vector.broadcast %26 : vector<1x128xf32> to vector<8x128xf32>
    %28 = arith.addf %25, %27 : vector<8x128xf32>
    %c0_16 = arith.constant 0 : index
    %c0_17 = arith.constant 0 : index
    %29 = vector.load %arg10[%c0_16, %c0_17] : memref<8x128xf32, #tpu.memory_space<vmem>>, vector<8x128xf32>
    tpu.vector_store %arg10[%c0_16, %c0_17], %28 {strides = array<i32>} : memref<8x128xf32, #tpu.memory_space<vmem>>, vector<8x128xf32>,
    return
  }
  func.func @transform_0(%arg0: i32) -> (i32, i32) {
    %c0_i32 = arith.constant 0 : i32
    %c0_i32_0 = arith.constant 0 : i32
    return %arg0, %c0_i32 : i32, i32
  }
  func.func @transform_1(%arg0: i32) -> (i32, i32) {
    %c0_i32 = arith.constant 0 : i32
    %c0_i32_0 = arith.constant 0 : i32
    return %arg0, %c0_i32 : i32, i32
  }
  func.func @transform_2(%arg0: i32) -> (i32, i32) {
    %c0_i32 = arith.constant 0 : i32
    %c0_i32_0 = arith.constant 0 : i32
    return %arg0, %c0_i32 : i32, i32
  }
  func.func @transform_3(%arg0: i32) -> (i32, i32) {
    %c0_i32 = arith.constant 0 : i32
    %c0_i32_0 = arith.constant 0 : i32
    %c0_i32_1 = arith.constant 0 : i32
    return %c0_i32, %c0_i32_0 : i32, i32
  }
  func.func @transform_4(%arg0: i32) -> (i32, i32) {
    %c0_i32 = arith.constant 0 : i32
    %c0_i32_0 = arith.constant 0 : i32
    %c0_i32_1 = arith.constant 0 : i32
    return %c0_i32, %c0_i32_0 : i32, i32
  }
  func.func @transform_5(%arg0: i32) -> (i32, i32, i32) {
    %c0_i32 = arith.constant 0 : i32
    %c0_i32_0 = arith.constant 0 : i32
    %c0_i32_1 = arith.constant 0 : i32
    %c0_i32_2 = arith.constant 0 : i32
    return %c0_i32, %c0_i32_0, %c0_i32_1 : i32, i32, i32
  }
  func.func @transform_6(%arg0: i32) -> (i32, i32, i32) {
    %c0_i32 = arith.constant 0 : i32
    %c0_i32_0 = arith.constant 0 : i32
    %c0_i32_1 = arith.constant 0 : i32
    %c0_i32_2 = arith.constant 0 : i32
    return %c0_i32, %c0_i32_0, %c0_i32_1 : i32, i32, i32
  }
  func.func @transform_7(%arg0: i32) -> (i32, i32) {
    %c0_i32 = arith.constant 0 : i32
    %c0_i32_0 = arith.constant 0 : i32
    %c0_i32_1 = arith.constant 0 : i32
    return %c0_i32, %c0_i32_0 : i32, i32
  }
  func.func @transform_8(%arg0: i32) -> (i32, i32) {
    %c0_i32 = arith.constant 0 : i32
    %c0_i32_0 = arith.constant 0 : i32
    %c0_i32_1 = arith.constant 0 : i32
    return %c0_i32, %c0_i32_0 : i32, i32
  }
  func.func @transform_9(%arg0: i32) -> (i32, i32) {
    %c0_i32 = arith.constant 0 : i32
    %c0_i32_0 = arith.constant 0 : i32
    return %arg0, %c0_i32 : i32, i32
  }
}

</mosaic_0001>

<bundles_post_ra>
// kernel: fully_connected_forward.1
= control target key start
LH: loop header
LB: loop body
LE: loop exit
PB: predicated region body
PF: predicated region fallthrough
CT: control target
= control target key end

     0   :  { %v843_v0 = vmov 0   ;;  %s1069_s0 = inlined_call_operand.vmem [shape: f32[8,1], index: 0, kind: input, shape index: {}]   ;;  %s1070_s2 = inlined_call_operand.vmem [shape: f32[8,1], index: 2, kind: input, shape index: {}]   ;;  %s1071_s1 = inlined_call_operand.vmem [shape: f32[8,1], index: 1, kind: input, shape index: {}]   ;;  %s1072_s5 = inlined_call_operand.vmem [shape: bf16[10,256,256], index: 5, kind: input, shape index: {}]   ;;  %s1073_s6 = inlined_call_operand.vmem [shape: f32[10,1,256], index: 6, kind: input, shape index: {}]   ;;  %s1074_s7 = inlined_call_operand.vmem [shape: bf16[256,128], index: 7, kind: input, shape index: {}]   ;;  %s1075_s8 = inlined_call_operand.vmem [shape: f32[1,128], index: 8, kind: input, shape index: {}]   ;;  %s1076_s9 = inlined_call_operand.vmem [shape: f32[8,128], index: 9, kind: output, shape index: {}]   ;;  %s1077_s3 = inlined_call_operand.vmem [shape: f32[3,256], index: 3, kind: input, shape index: {}]   ;;  %s1078_s4 = inlined_call_operand.vmem [shape: f32[1,256], index: 4, kind: input, shape index: {}]  }
   0x1   :  { %808 = vset.pattern.permute.xlu0 %v843_v0  ;;  %v32_v1 = vld [vmem:[%s1069_s0] sm:$0xff]  ;;  %809 = vset.pattern.permute.xlu1 %v843_v0 }
   0x2   :  { %v63_v2 = vld [vmem:[%s1070_s2] sm:$0xff]  ;;  %36 = vperm.xlu0 %808, %v32_v1  }
   0x3   :  { %68 = vperm.xlu1 %809, %v63_v2   ;;  %v46_v3 = vld [vmem:[%s1071_s1] sm:$0xff] }
   0x4   :  { %v33_v5 = vld [vmem:[%s1077_s3] ss:$4 sm:$0x3]  ;;  %v537_v6 = vld [vmem:[%s1077_s3 + $0x1] ss:$4 sm:$0x3] }
   0x5   :  { %v538_v7 = vld [vmem:[%s1077_s3 + $0x2] ss:$4 sm:$0x3]  ;;  %v40_v8 = vperm.slane %v33_v5, 0  ;;  %v41_v9 = vperm.slane %v33_v5, 1  ;;  %v55_v10 = vperm.slane %v537_v6, 0 }
   0x6   :  { %v56_v11 = vperm.slane %v537_v6, 1  ;;  %v72_v12 = vperm.slane %v538_v7, 0  ;;  %v73_v13 = vperm.slane %v538_v7, 1  ;;  %v80_v18 = vld [vmem:[%s1078_s4] sm:$0x3]  ;;  %s919_s3 = smov 0  }
   0x7   :  { %v82_v25 = vperm.slane %v80_v18, 0  ;;  %v83_v26 = vperm.slane %v80_v18, 1 }
   0xa   :  { %51 = vperm.xlu0 %808, %v46_v3  }
  0x74   :  { %v37_v4 = vpop.permute.xlu0 %36 }
  0x75   :  { %v69_v14 = vpop.permute.xlu1 %68  ;;  %v44_v15 = vmul.f32 %v40_v8, %v37_v4  ;;  %v45_v16 = vmul.f32 %v41_v9, %v37_v4 }
  0x76   :  { %v76_v21 = vmul.f32 %v72_v12, %v69_v14  ;;  %v77_v22 = vmul.f32 %v73_v13, %v69_v14 }
  0x7c   :  { %v52_v17 = vpop.permute.xlu0 %51 }
  0x7d   :  { %v59_v19 = vmul.f32 %v55_v10, %v52_v17  ;;  %v60_v20 = vmul.f32 %v56_v11, %v52_v17 }
  0x7f   :  { %v61_v23 = vadd.f32 %v59_v19, %v44_v15  ;;  %v62_v24 = vadd.f32 %v60_v20, %v45_v16 }
  0x81   :  { %v78_v27 = vadd.f32 %v76_v21, %v61_v23  ;;  %v79_v28 = vadd.f32 %v77_v22, %v62_v24 }
  0x83   :  { %v86_v29 = vadd.f32 %v82_v25, %v78_v27  ;;  %v87_v30 = vadd.f32 %v83_v26, %v79_v28 }
  0x85   :  { %810 = vtanh.f32 %v86_v29 }
  0x86   :  { %812 = vtanh.f32 %v87_v30 }
  0x8b   :  { %v811_v31 = vpop.eup %810  }
  0x8c   :  { %v813_v32 = vpop.eup %812  }
  0x8d LB: > { %s734_s4 = sshll.u32 %s841_s3, 8  ;;  %s541_s23 = sshll.u32 %s841_s3, 1  ;;  %s841_s3 = sphi %s919_s3, %s95_s3   ;;  %v837_v31 = vphi %v811_v31, %v1080_v31   ;;  %v833_v32 = vphi %v813_v32, %v1079_v32  }
  0x8e   : > { %s934_s22 = scalar_lea.vmem %s1072_s5, %s734_s4  ;;  %s136_s26 = scalar_lea.vmem %s1073_s6, %s541_s23 }
  0x8f   : > { %v600_v33 = vld [vmem:[%s934_s22 + $0x70] sm:$0xf]  ;;  %v750_v34 = vld [vmem:[%s934_s22 + $0x74] sm:$0xf0]  ;;  %v749_v38 = vld [vmem:[%s934_s22 + $0x74] sm:$0xf] }
  0x90   : > { %v664_v35 = vld [vmem:[%s934_s22 + $0xf0] sm:$0xf]  ;;  %v601_v36 = vor.u32 %v750_v34, %v600_v33  ;;  %v766_v37 = vld [vmem:[%s934_s22 + $0xf4] sm:$0xf0]  ;;  %v602_v39 = vld [vmem:[%s934_s22 + $0x78] sm:$0xf0] }
  0x91   : > { %v665_v40 = vor.u32 %v766_v37, %v664_v35  ;;  %v605_v41 = vor.u32 %v749_v38, %v602_v39  ;;  %v765_v42 = vld [vmem:[%s934_s22 + $0xf4] sm:$0xf]  ;;  %v666_v43 = vld [vmem:[%s934_s22 + $0xf8] sm:$0xf0]  ;;  %v592_v44 = vld [vmem:[%s934_s22 + $0x60] sm:$0xf] }
  0x92   : > { %303 = vmatpush.bf16.msra.mxu0 %v601_v36  ;;  %v669_v45 = vor.u32 %v765_v42, %v666_v43  ;;  %v748_v46 = vld [vmem:[%s934_s22 + $0x64] sm:$0xf0]  ;;  %v656_v47 = vld [vmem:[%s934_s22 + $0xe0] sm:$0xf]  ;;  %v747_v51 = vld [vmem:[%s934_s22 + $0x64] sm:$0xf] }
  0x93   : > { %v764_v48 = vld [vmem:[%s934_s22 + $0xe4] sm:$0xf0]  ;;  %316 = vmatpush.bf16.msra.mxu1 %v665_v40  ;;  %329 = vmatpush.bf16.msra.mxu2 %v605_v41  ;;  %v593_v49 = vor.u32 %v748_v46, %v592_v44  ;;  %v594_v52 = vld [vmem:[%s934_s22 + $0x68] sm:$0xf0]  ;;  %v763_v53 = vld [vmem:[%s934_s22 + $0xe4] sm:$0xf] }
  0x94   : > { %v657_v50 = vor.u32 %v764_v48, %v656_v47  ;;  %342 = vmatpush.bf16.msra.mxu3 %v669_v45  ;;  %v597_v54 = vor.u32 %v747_v51, %v594_v52  ;;  %v658_v55 = vld [vmem:[%s934_s22 + $0xe8] sm:$0xf0]  ;;  %v584_v56 = vld [vmem:[%s934_s22 + $0x50] sm:$0xf]  ;;  %v746_v57 = vld [vmem:[%s934_s22 + $0x54] sm:$0xf0] }
  0x95   : > { %v661_v58 = vor.u32 %v763_v53, %v658_v55  ;;  %v648_v59 = vld [vmem:[%s934_s22 + $0xd0] sm:$0xf]  ;;  %v762_v60 = vld [vmem:[%s934_s22 + $0xd4] sm:$0xf0]  ;;  %v745_v61 = vld [vmem:[%s934_s22 + $0x54] sm:$0xf]  ;;  %v585_v62 = vor.u32 %v746_v57, %v584_v56 }
  0x96   : > { %304 = vmatpush.bf16.msra.mxu0 %v593_v49  ;;  %v586_v63 = vld [vmem:[%s934_s22 + $0x58] sm:$0xf0]  ;;  %v761_v0 = vld [vmem:[%s934_s22 + $0xd4] sm:$0xf]  ;;  %v649_v2 = vor.u32 %v762_v60, %v648_v59  ;;  %v576_v4 = vld [vmem:[%s934_s22 + $0x40] sm:$0xf] }
  0x97   : > { %v650_v1 = vld [vmem:[%s934_s22 + $0xd8] sm:$0xf0]  ;;  %317 = vmatpush.bf16.msra.mxu1 %v657_v50  ;;  %330 = vmatpush.bf16.msra.mxu2 %v597_v54  ;;  %v589_v3 = vor.u32 %v745_v61, %v586_v63  ;;  %v744_v5 = vld [vmem:[%s934_s22 + $0x44] sm:$0xf0]  ;;  %v640_v6 = vld [vmem:[%s934_s22 + $0xc0] sm:$0xf] }
  0x98   : > { %343 = vmatpush.bf16.msra.mxu3 %v661_v58  ;;  %v653_v7 = vor.u32 %v761_v0, %v650_v1  ;;  %v760_v8 = vld [vmem:[%s934_s22 + $0xc4] sm:$0xf0]  ;;  %v743_v9 = vld [vmem:[%s934_s22 + $0x44] sm:$0xf]  ;;  %v578_v10 = vld [vmem:[%s934_s22 + $0x48] sm:$0xf0]  ;;  %v577_v13 = vor.u32 %v744_v5, %v576_v4  ;;  %v99_v4 = vpack.c.bf16 %v833_v32, %v833_v32 }
  0x99   : > { %v759_v11 = vld [vmem:[%s934_s22 + $0xc4] sm:$0xf]  ;;  %v642_v12 = vld [vmem:[%s934_s22 + $0xc8] sm:$0xf0]  ;;  %v641_v14 = vor.u32 %v760_v8, %v640_v6  ;;  %v581_v15 = vor.u32 %v743_v9, %v578_v10  ;;  %v568_v16 = vld [vmem:[%s934_s22 + $0x30] sm:$0xf] }
  0x9a   : > { %305 = vmatpush.bf16.msra.mxu0 %v585_v62  ;;  %v742_v17 = vld [vmem:[%s934_s22 + $0x34] sm:$0xf0]  ;;  %v632_v18 = vld [vmem:[%s934_s22 + $0xb0] sm:$0xf]  ;;  %v645_v19 = vor.u32 %v759_v11, %v642_v12  ;;  %v741_v21 = vld [vmem:[%s934_s22 + $0x34] sm:$0xf] }
  0x9b   : > { %318 = vmatpush.bf16.msra.mxu1 %v649_v2  ;;  %331 = vmatpush.bf16.msra.mxu2 %v589_v3  ;;  %v758_v20 = vld [vmem:[%s934_s22 + $0xb4] sm:$0xf0]  ;;  %v570_v22 = vld [vmem:[%s934_s22 + $0x38] sm:$0xf0]  ;;  %v757_v23 = vld [vmem:[%s934_s22 + $0xb4] sm:$0xf]  ;;  %v569_v25 = vor.u32 %v742_v17, %v568_v16  ;;  %v98_v3 = vpack.c.bf16 %v837_v31, %v837_v31 }
  0x9c   : > { %344 = vmatpush.bf16.msra.mxu3 %v653_v7  ;;  %v634_v24 = vld [vmem:[%s934_s22 + $0xb8] sm:$0xf0]  ;;  %v633_v26 = vor.u32 %v758_v20, %v632_v18  ;;  %v573_v27 = vor.u32 %v741_v21, %v570_v22  ;;  %v560_v28 = vld [vmem:[%s934_s22 + $0x20] sm:$0xf]  ;;  %v740_v29 = vld [vmem:[%s934_s22 + $0x24] sm:$0xf0] }
  0x9d   : > { %v624_v30 = vld [vmem:[%s934_s22 + $0xa0] sm:$0xf]  ;;  %v637_v33 = vor.u32 %v757_v23, %v634_v24  ;;  %v756_v34 = vld [vmem:[%s934_s22 + $0xa4] sm:$0xf0]  ;;  %v739_v35 = vld [vmem:[%s934_s22 + $0x24] sm:$0xf]  ;;  %v561_v39 = vor.u32 %v740_v29, %v560_v28 }
  0x9e   : > { %306 = vmatpush.bf16.msra.mxu0 %v577_v13  ;;  %v562_v36 = vld [vmem:[%s934_s22 + $0x28] sm:$0xf0]  ;;  %v755_v37 = vld [vmem:[%s934_s22 + $0xa4] sm:$0xf]  ;;  %v625_v40 = vor.u32 %v756_v34, %v624_v30  ;;  %v552_v42 = vld [vmem:[%s934_s22 + $0x10] sm:$0xf] }
  0x9f   : > { %319 = vmatpush.bf16.msra.mxu1 %v641_v14  ;;  %332 = vmatpush.bf16.msra.mxu2 %v581_v15  ;;  %v626_v38 = vld [vmem:[%s934_s22 + $0xa8] sm:$0xf0]  ;;  %v565_v41 = vor.u32 %v739_v35, %v562_v36  ;;  %v738_v43 = vld [vmem:[%s934_s22 + $0x14] sm:$0xf0]  ;;  %v616_v44 = vld [vmem:[%s934_s22 + $0x90] sm:$0xf] }
  0xa0   : > { %345 = vmatpush.bf16.msra.mxu3 %v645_v19  ;;  %v629_v45 = vor.u32 %v755_v37, %v626_v38  ;;  %v754_v46 = vld [vmem:[%s934_s22 + $0x94] sm:$0xf0]  ;;  %v737_v47 = vld [vmem:[%s934_s22 + $0x14] sm:$0xf]  ;;  %v554_v48 = vld [vmem:[%s934_s22 + $0x18] sm:$0xf0]  ;;  %v553_v51 = vor.u32 %v738_v43, %v552_v42 }
  0xa1   : > { %v753_v49 = vld [vmem:[%s934_s22 + $0x94] sm:$0xf]  ;;  %v618_v50 = vld [vmem:[%s934_s22 + $0x98] sm:$0xf0]  ;;  %v617_v52 = vor.u32 %v754_v46, %v616_v44  ;;  %v557_v53 = vor.u32 %v737_v47, %v554_v48  ;;  %v544_v54 = vld [vmem:[%s934_s22] sm:$0xf] }
  0xa2   : > { %307 = vmatpush.bf16.msra.mxu0 %v569_v25  ;;  %v736_v55 = vld [vmem:[%s934_s22 + $0x4] sm:$0xf0]  ;;  %v608_v56 = vld [vmem:[%s934_s22 + $0x80] sm:$0xf]  ;;  %v621_v57 = vor.u32 %v753_v49, %v618_v50  ;;  %v735_v59 = vld [vmem:[%s934_s22 + $0x4] sm:$0xf] }
  0xa3   : > { %320 = vmatpush.bf16.msra.mxu1 %v633_v26  ;;  %333 = vmatpush.bf16.msra.mxu2 %v573_v27  ;;  %v752_v58 = vld [vmem:[%s934_s22 + $0x84] sm:$0xf0]  ;;  %v546_v60 = vld [vmem:[%s934_s22 + $0x8] sm:$0xf0]  ;;  %v751_v61 = vld [vmem:[%s934_s22 + $0x84] sm:$0xf]  ;;  %v545_v63 = vor.u32 %v736_v55, %v544_v54 }
  0xa4   : > { %346 = vmatpush.bf16.msra.mxu3 %v637_v33  ;;  %v610_v62 = vld [vmem:[%s934_s22 + $0x88] sm:$0xf0]  ;;  %v609_v0 = vor.u32 %v752_v58, %v608_v56  ;;  %v549_v1 = vor.u32 %v735_v59, %v546_v60  ;;  %v137_v5 = vld [vmem:[%s136_s26] sm:$0x3]  ;;  %s95_s3 = sadd.s32 1, %s841_s3  }
  0xa5   : > { %v613_v2 = vor.u32 %v751_v61, %v610_v62  ;;  %v139_v6 = vperm.slane %v137_v5, 0  ;;  %v140_v10 = vperm.slane %v137_v5, 1  ;;  %p92_p0 = scmp.ge.s32.totalorder %s95_s3, 10  }
  0xa6   : > { %308 = vmatpush.bf16.msra.mxu0 %v561_v39  ;;  %v774_v20 = vld [vmem:[%s1074_s7 + $0x38] sm:$0xff] (%p92_p0)  ;;  %v773_v22 = vld [vmem:[%s1074_s7 + $0x30] sm:$0xff] (%p92_p0)  ;;  %v772_v24 = vld [vmem:[%s1074_s7 + $0x28] sm:$0xff] (%p92_p0) }
  0xa7   : > { %321 = vmatpush.bf16.msra.mxu1 %v625_v40  ;;  %334 = vmatpush.bf16.msra.mxu2 %v565_v41  ;;  %v782_v21 = vld [vmem:[%s1074_s7 + $0x78] sm:$0xff] (%p92_p0)  ;;  %v781_v23 = vld [vmem:[%s1074_s7 + $0x70] sm:$0xff] (%p92_p0)  ;;  %v780_v25 = vld [vmem:[%s1074_s7 + $0x68] sm:$0xff] (%p92_p0) }
  0xa8   : > { %347 = vmatpush.bf16.msra.mxu3 %v629_v45  ;;  %v771_v26 = vld [vmem:[%s1074_s7 + $0x20] sm:$0xff] (%p92_p0)  ;;  %v770_v28 = vld [vmem:[%s1074_s7 + $0x18] sm:$0xff] (%p92_p0)  ;;  %v769_v30 = vld [vmem:[%s1074_s7 + $0x10] sm:$0xff] (%p92_p0) }
  0xa9   :  { %v779_v27 = vld [vmem:[%s1074_s7 + $0x60] sm:$0xff] (%p92_p0)  ;;  %v778_v29 = vld [vmem:[%s1074_s7 + $0x58] sm:$0xff] (%p92_p0)  ;;  %v777_v33 = vld [vmem:[%s1074_s7 + $0x50] sm:$0xff] (%p92_p0) }
  0xaa   : > { %309 = vmatpush.bf16.msra.mxu0 %v553_v51  ;;  %v768_v34 = vld [vmem:[%s1074_s7 + $0x8] sm:$0xff] (%p92_p0)  ;;  %v767_v36 = vld [vmem:[%s1074_s7] sm:$0xff] (%p92_p0) }
  0xab   : > { %322 = vmatpush.bf16.msra.mxu1 %v617_v52  ;;  %335 = vmatpush.bf16.msra.mxu2 %v557_v53  ;;  %v776_v35 = vld [vmem:[%s1074_s7 + $0x48] sm:$0xff] (%p92_p0)  ;;  %v775_v37 = vld [vmem:[%s1074_s7 + $0x40] sm:$0xff] (%p92_p0) }
  0xac   : > { %348 = vmatpush.bf16.msra.mxu3 %v621_v57  ;;  %v818_v40 = vld [vmem:[%s1075_s8] ss:$0 sm:$0xff] (%p92_p0) }
  0xae   : > { %310 = vmatpush.bf16.msra.mxu0 %v545_v63 }
  0xaf   : > { %323 = vmatpush.bf16.msra.mxu1 %v609_v0  ;;  %336 = vmatpush.bf16.msra.mxu2 %v549_v1 }
  0xb0   : > { %349 = vmatpush.bf16.msra.mxu3 %v613_v2 }
  0xb1   : > { %311 = vmatmul.bf16.vlgmr.msra.gmra.mxu0 %v98_v3 }
  0xb2   : > { %324 = vmatmul.bf16.vlgmr.msra.gmra.mxu1 %v99_v4  ;;  %337 = vmatmul.bf16.vlgmr.msra.gmra.mxu2 %v98_v3 }
  0xb3   : > { %350 = vmatmul.bf16.vlgmr.msra.gmra.mxu3 %v99_v4  ;;  %491 = vmatpush.bf16.msra.mxu0 (%p92_p0), %v774_v20 }
  0xb4   :  { %504 = vmatpush.bf16.msra.mxu1 (%p92_p0), %v782_v21 }
  0xb7   :  { %492 = vmatpush.bf16.msra.mxu0 (%p92_p0), %v773_v22 }
  0xb8   :  { %505 = vmatpush.bf16.msra.mxu1 (%p92_p0), %v781_v23 }
  0xbb   :  { %493 = vmatpush.bf16.msra.mxu0 (%p92_p0), %v772_v24 }
  0xbc   :  { %506 = vmatpush.bf16.msra.mxu1 (%p92_p0), %v780_v25 }
  0xbf   :  { %494 = vmatpush.bf16.msra.mxu0 (%p92_p0), %v771_v26 }
  0xc0   :  { %507 = vmatpush.bf16.msra.mxu1 (%p92_p0), %v779_v27 }
  0xc3   :  { %495 = vmatpush.bf16.msra.mxu0 (%p92_p0), %v770_v28 }
  0xc4   :  { %508 = vmatpush.bf16.msra.mxu1 (%p92_p0), %v778_v29 }
  0xc7   :  { %496 = vmatpush.bf16.msra.mxu0 (%p92_p0), %v769_v30 }
  0xc8   :  { %509 = vmatpush.bf16.msra.mxu1 (%p92_p0), %v777_v33 }
  0xcb   :  { %497 = vmatpush.bf16.msra.mxu0 (%p92_p0), %v768_v34 }
  0xcc   :  { %510 = vmatpush.bf16.msra.mxu1 (%p92_p0), %v776_v35 }
  0xcf   :  { %498 = vmatpush.bf16.msra.mxu0 (%p92_p0), %v767_v36 }
  0xd0   :  { %511 = vmatpush.bf16.msra.mxu1 (%p92_p0), %v775_v37 }
 0x12e   : > { %v312_v7 = vpop.f32.mrf.mxu0 }
 0x12f   : > { %v313_v31 = vadd.f32 %v312_v7, %v139_v6  ;;  %v325_v8 = vpop.f32.mrf.mxu1 }
 0x131   : > { %v326_v9 = vadd.f32 %v325_v8, %v313_v31 }
 0x133   : > { %814 = vtanh.f32 %v326_v9 }
 0x135   : > { %v338_v32 = vpop.f32.mrf.mxu2 }
 0x136   : > { %v339_v11 = vadd.f32 %v338_v32, %v140_v10  ;;  %v351_v12 = vpop.f32.mrf.mxu3  ;;  %v314_v13 = vpop.f32.mrf.mxu0 }
 0x137   : > { %v327_v14 = vpop.f32.mrf.mxu1 }
 0x138   : > { %v352_v15 = vadd.f32 %v351_v12, %v339_v11 }
 0x139   : > { %v815_v16 = vpop.eup %814  }
 0x13a   : > { %816 = vtanh.f32 %v352_v15  ;;  %v1080_v31 = vmov %v815_v16  ;;  %v357_v38 = vpack.c.bf16 (%p92_p0), %v815_v16, %v815_v16 }
 0x13c   :  { %499 = vmatmul.bf16.vlgmr.msra.gmra.mxu0 (%p92_p0), %v357_v38 }
 0x13d   : > { %v340_v17 = vpop.f32.mrf.mxu2  ;;  %94 = sbr.rel (!%p92_p0) target bundleno = 141 (0x8d), region = 67 }
 0x13e   : > { %v353_v18 = vpop.f32.mrf.mxu3 }
 0x140   : > { %v817_v19 = vpop.eup %816  }
 0x141   : > { %v1079_v32 = vmov %v817_v19  ;;  %v358_v39 = vpack.c.bf16 (%p92_p0), %v817_v19, %v817_v19 }
 0x143   :  { %512 = vmatmul.bf16.vlgmr.msra.gmra.mxu1 %v358_v39 }
 0x1b9   :  { %v500_v41 = vpop.f32.mrf.mxu0 }
 0x1ba   :  { %v501_v43 = vadd.f32 %v818_v40, %v500_v41 }
 0x1c0   :  { %v513_v42 = vpop.f32.mrf.mxu1 }
 0x1c1   :  { %v514_v44 = vadd.f32 %v513_v42, %v501_v43  ;;  %v502_v45 = vpop.f32.mrf.mxu0 }
 0x1c3   :  { %517 = vst [vmem:[%s1076_s9] sm:$0xff] %v514_v44 }
 0x1c8   :  { %v515_v46 = vpop.f32.mrf.mxu1 }

</bundles_post_ra>
